<compile_context>
chip_gen: v6e
topology: v6e:2x2x1
jax: 0.10.0
libtpu: 0.0.40
codegen_flags: <defaults>
</compile_context>

<pallas_src>
import functools
import math

import jax
import jax.numpy as jnp
from jax import lax
from jax.experimental import pallas as pl
from jax.experimental.pallas import tpu as pltpu


def _round_up(x, m):
    return ((x + m - 1) // m) * m


def _pick_tile(total, unit, cap):
    """Largest multiple of `unit` that divides `total` and is <= cap."""
    best = unit
    d = unit
    limit = min(total, cap)
    while d <= limit:
        if total % d == 0:
            best = d
        d += unit
    return best


def _flash_sdpa_kernel(q_ref, k_ref, v_ref, bias_ref, o_ref,
                       q_scr, m_scr, l_scr, acc_scr,
                       *, scale, needs_mask):
    kv = pl.program_id(1)

    @pl.when(kv == 0)
    def _():
        # q only changes once per query tile: fold 1/sqrt(D) into it here so
        # the (tq, Dp) scaling is not re-executed on every KV step.
        q_scr[...] = (q_ref[...].astype(jnp.float32) * scale).astype(q_scr.dtype)
        m_scr[...] = jnp.full_like(m_scr, -jnp.inf)
        l_scr[...] = jnp.zeros_like(l_scr)
        acc_scr[...] = jnp.zeros_like(acc_scr)

    # scores = q @ k^T without an explicit transpose: contract the last dims.
    s = lax.dot_general(q_scr[...], k_ref[...], (((1,), (1,)), ((), ())),
                        preferred_element_type=jnp.float32)      # (tq, tk) f32

    if needs_mask:
        # Additive bias row: 0 for valid keys, -1e30 for zero-padded keys.
        s = s + bias_ref[...]

    m_prev = m_scr[...]
    m_new = jnp.maximum(m_prev, jnp.max(s, axis=1, keepdims=True))
    alpha = jnp.exp(m_prev - m_new)
    # TODO(synk): on v6e/v7x a bf16 exp / bf16 probability tile (bf16 EUP/VPU)
    # would roughly halve the softmax cost; kept in f32 so the same kernel is
    # accurate on v5e (no bf16 VPU/EUP there).
    p = jnp.exp(s - m_new)

    l_scr[...] = alpha * l_scr[...] + jnp.sum(p, axis=1, keepdims=True)
    acc_scr[...] = alpha * acc_scr[...] + jnp.dot(
        p.astype(v_ref.dtype), v_ref[...], preferred_element_type=jnp.float32)
    m_scr[...] = m_new

    @pl.when(kv == pl.num_programs(1) - 1)
    def _():
        # Exact normalization (runs once per output tile, essentially free).
        o_ref[...] = (acc_scr[...] / l_scr[...]).astype(o_ref.dtype)


def scaled_dot_prod_attention(query, key, value, mask=None, *,
                              tq_max=512, tk_max=512, compute_dtype=None):
    """Pallas equivalent of ScaledDotProdAttention.forward (mask unsupported)."""
    # TODO(synk): the PyTorch `mask` path scatters -inf at arbitrary (row, col)
    # index lists before the softmax; if needed, implement it as an additive
    # -inf bias tile (like the key-padding bias below), not as a scatter.
    assert mask is None, "mask path not implemented"

    Lq, D = query.shape
    Lk, Dk = key.shape
    Lv, Dv = value.shape
    assert D == Dk and Lk == Lv

    scale = 1.0 / math.sqrt(float(D))

    # MXU operand dtype: bf16 (with f32 accumulation) when inputs are f32 —
    # the v5e MXU is bf16-only and f32 matmuls are multi-pass on v6e/v7x too.
    if compute_dtype is None:
        compute_dtype = jnp.bfloat16 if query.dtype == jnp.float32 else query.dtype

    # Padding policy: round sequence lengths up to the minimal hardware granule
    # FIRST (8 sublanes for queries, 128 lanes for the key axis, which becomes
    # the lane dim of the scores tile), then pick tiles that divide them.
    Dp = _round_up(D, 128)
    Dvp = _round_up(Dv, 128)
    Lq_p = _round_up(Lq, 8)
    Lk_p = _round_up(Lk, 128)

    tq = _pick_tile(Lq_p, 8, tq_max)
    tk = _pick_tile(Lk_p, 128, tk_max)
    # Every KV tile has >= 1 valid (unpadded) key column, so a fully-masked
    # tile (which would corrupt the online softmax) cannot occur.
    assert Lk_p - Lk < 128 <= tk and Lk_p % tk == 0 and Lq_p % tq == 0

    # TODO(synk): with a single 32-wide head, 3/4 of the padded 128-lane
    # feature dim is wasted; for multi-head use, pack 4 heads per 128 lanes
    # (or add a head grid axis) instead of padding each head separately.
    q_p = jnp.pad(query, ((0, Lq_p - Lq), (0, Dp - D))).astype(compute_dtype)
    k_p = jnp.pad(key,   ((0, Lk_p - Lk), (0, Dp - D))).astype(compute_dtype)
    v_p = jnp.pad(value, ((0, Lk_p - Lk), (0, Dvp - Dv))).astype(compute_dtype)

    needs_mask = Lk_p != Lk
    col = jnp.arange(Lk_p, dtype=jnp.int32)
    bias = jnp.where(col < Lk, 0.0, -1e30).astype(jnp.float32)[None, :]

    kernel = functools.partial(_flash_sdpa_kernel, scale=scale,
                               needs_mask=needs_mask)

    n_q, n_kv = Lq_p // tq, Lk_p // tk
    grid = (n_q, n_kv)

    in_itemsize = jnp.dtype(compute_dtype).itemsize
    out_itemsize = jnp.dtype(query.dtype).itemsize
    cost = pl.CostEstimate(
        flops=2 * Lq_p * Lk_p * (Dp + Dvp),
        transcendentals=Lq_p * Lk_p,
        # K/V are re-streamed from HBM once per query tile.
        bytes_accessed=(q_p.size + (k_p.size + v_p.size) * n_q) * in_itemsize
        + Lq_p * Dvp * out_itemsize,
    )

    out_p = pl.pallas_call(
        kernel,
        out_shape=jax.ShapeDtypeStruct((Lq_p, Dvp), query.dtype),
        grid_spec=pltpu.PrefetchScalarGridSpec(
            num_scalar_prefetch=0,
            grid=grid,
            in_specs=[
                pl.BlockSpec((tq, Dp), lambda qi, ki: (qi, 0)),
                pl.BlockSpec((tk, Dp), lambda qi, ki: (ki, 0)),
                pl.BlockSpec((tk, Dvp), lambda qi, ki: (ki, 0)),
                pl.BlockSpec((1, tk), lambda qi, ki: (0, ki)),
            ],
            out_specs=pl.BlockSpec((tq, Dvp), lambda qi, ki: (qi, 0)),
            scratch_shapes=[
                pltpu.VMEM((tq, Dp), compute_dtype),   # scaled/downcast q tile
                pltpu.VMEM((tq, 1), jnp.float32),      # running max
                pltpu.VMEM((tq, 1), jnp.float32),      # running sum
                pltpu.VMEM((tq, Dvp), jnp.float32),    # f32 output accumulator
            ],
        ),
        compiler_params=pltpu.CompilerParams(
            dimension_semantics=("parallel", "arbitrary"),
        ),
        cost_estimate=cost,
    )(q_p, k_p, v_p, bias)

    return out_p[:Lq, :Dv]


def _reference(query, key, value):
    scores = (query @ key.T) / jnp.sqrt(jnp.float32(query.shape[1]))
    probs = jax.nn.softmax(scores, axis=1)
    return probs @ value


if __name__ == "__main__":
    # Primary test: shapes implied by the module's forward (seq=8, hidden=32).
    kq, kk, kv = jax.random.split(jax.random.PRNGKey(0), 3)
    Lq, Lk, D, Dv = 8, 8, 32, 32
    q = jax.random.normal(kq, (Lq, D), dtype=jnp.float32)
    k = jax.random.normal(kk, (Lk, D), dtype=jnp.float32)
    v = jax.random.normal(kv, (Lk, Dv), dtype=jnp.float32)

    out = jax.block_until_ready(scaled_dot_prod_attention(q, k, v))
    ref = _reference(q, k, v)
    assert out.shape == (Lq, Dv)
    assert jnp.allclose(out, ref, atol=2e-2, rtol=2e-2), "mismatch vs reference (small)"

    # Secondary test: ragged shapes exercising the fixed padding policy and
    # the key-padding additive bias (Lq_p=264, Lk_p=384, single grid step).
    kq2, kk2, kv2 = jax.random.split(jax.random.PRNGKey(1), 3)
    Lq2, Lk2, D2, Dv2 = 264, 300, 48, 72
    q2 = jax.random.normal(kq2, (Lq2, D2), dtype=jnp.float32)
    k2 = jax.random.normal(kk2, (Lk2, D2), dtype=jnp.float32)
    v2 = jax.random.normal(kv2, (Lk2, Dv2), dtype=jnp.float32)

    out2 = jax.block_until_ready(scaled_dot_prod_attention(q2, k2, v2))
    ref2 = _reference(q2, k2, v2)
    assert out2.shape == (Lq2, Dv2)
    assert jnp.allclose(out2, ref2, atol=2e-2, rtol=2e-2), "mismatch vs reference (ragged)"

    # Third test: multi-tile grid along both axes to exercise the online
    # softmax accumulation across several KV steps and query tiles.
    kq3, kk3, kv3 = jax.random.split(jax.random.PRNGKey(2), 3)
    Lq3, Lk3, D3, Dv3 = 256, 1024, 64, 64
    q3 = jax.random.normal(kq3, (Lq3, D3), dtype=jnp.float32)
    k3 = jax.random.normal(kk3, (Lk3, D3), dtype=jnp.float32)
    v3 = jax.random.normal(kv3, (Lk3, Dv3), dtype=jnp.float32)

    out3 = jax.block_until_ready(
        scaled_dot_prod_attention(q3, k3, v3, tq_max=128, tk_max=256))
    ref3 = _reference(q3, k3, v3)
    assert out3.shape == (Lq3, Dv3)
    assert jnp.allclose(out3, ref3, atol=2e-2, rtol=2e-2), "mismatch vs reference (multi-tile)"

    print("KERNEL_OK")
</pallas_src>

<mosaic_0001>
module attributes {stable_mosaic.version = 11 : i64} {
  func.func @_flash_sdpa_kernel(%arg0: i32, %arg1: i32, %arg2: memref<8x128xbf16, #tpu.memory_space<vmem>>, %arg3: memref<128x128xbf16, #tpu.memory_space<vmem>>, %arg4: memref<128x128xbf16, #tpu.memory_space<vmem>>, %arg5: memref<1x128xf32, #tpu.memory_space<vmem>>, %arg6: memref<8x128xf32, #tpu.memory_space<vmem>>, %arg7: memref<8x128xbf16, #tpu.memory_space<vmem>>, %arg8: memref<8x1xf32, #tpu.memory_space<vmem>>, %arg9: memref<8x1xf32, #tpu.memory_space<vmem>>, %arg10: memref<8x128xf32, #tpu.memory_space<vmem>>) attributes {dimension_semantics = [#tpu.dimension_semantics<parallel>, #tpu.dimension_semantics<arbitrary>], iteration_bounds = array<i64: 1, 1>, scalar_prefetch = 0 : i64, scratch_operands = 4 : i64, tpu.core_type = #tpu.core_type<tc>, window_params = [{transform_indices = @transform_0, window_bounds = array<i64: 8, 128>}, {transform_indices = @transform_1, window_bounds = array<i64: 128, 128>}, {transform_indices = @transform_2, window_bounds = array<i64: 128, 128>}, {transform_indices = @transform_3, window_bounds = array<i64: 1, 128>}, {transform_indices = @transform_4, window_bounds = array<i64: 8, 128>}]} {
    %c0_i32 = arith.constant 0 : i32
    %0 = arith.cmpi eq, %arg1, %c0_i32 : i32
    %1 = arith.extui %0 : i1 to i32
    %c0_i32_0 = arith.constant 0 : i32
    %2 = arith.cmpi ne, %1, %c0_i32_0 : i32
    scf.if %2 {
      %c0_25 = arith.constant 0 : index
      %c0_26 = arith.constant 0 : index
      %36 = vector.load %arg2[%c0_25, %c0_26] : memref<8x128xbf16, #tpu.memory_space<vmem>>, vector<8x128xbf16>
      %37 = arith.extf %36 : vector<8x128xbf16> to vector<8x128xf32>
      %cst_27 = arith.constant 0.176776692 : f32
      %38 = vector.broadcast %cst_27 : f32 to vector<8x128xf32>
      %39 = arith.mulf %37, %38 : vector<8x128xf32>
      %40 = arith.truncf %39 : vector<8x128xf32> to vector<8x128xbf16>
      %c0_28 = arith.constant 0 : index
      %c0_29 = arith.constant 0 : index
      %41 = vector.load %arg7[%c0_28, %c0_29] : memref<8x128xbf16, #tpu.memory_space<vmem>>, vector<8x128xbf16>
      tpu.vector_store %arg7[%c0_28, %c0_29], %40 {strides = array<i32>} : memref<8x128xbf16, #tpu.memory_space<vmem>>, vector<8x128xbf16>,
      %cst_30 = arith.constant 0xFF800000 : f32
      %42 = vector.broadcast %cst_30 : f32 to vector<8x1xf32>
      %c0_31 = arith.constant 0 : index
      %c0_32 = arith.constant 0 : index
      %43 = vector.load %arg8[%c0_31, %c0_32] : memref<8x1xf32, #tpu.memory_space<vmem>>, vector<8x1xf32>
      tpu.vector_store %arg8[%c0_31, %c0_32], %42 {strides = array<i32>} : memref<8x1xf32, #tpu.memory_space<vmem>>, vector<8x1xf32>,
      %cst_33 = arith.constant 0.000000e+00 : f32
      %44 = vector.broadcast %cst_33 : f32 to vector<8x1xf32>
      %c0_34 = arith.constant 0 : index
      %c0_35 = arith.constant 0 : index
      %45 = vector.load %arg9[%c0_34, %c0_35] : memref<8x1xf32, #tpu.memory_space<vmem>>, vector<8x1xf32>
      tpu.vector_store %arg9[%c0_34, %c0_35], %44 {strides = array<i32>} : memref<8x1xf32, #tpu.memory_space<vmem>>, vector<8x1xf32>,
      %cst_36 = arith.constant 0.000000e+00 : f32
      %46 = vector.broadcast %cst_36 : f32 to vector<8x128xf32>
      %c0_37 = arith.constant 0 : index
      %c0_38 = arith.constant 0 : index
      %47 = vector.load %arg10[%c0_37, %c0_38] : memref<8x128xf32, #tpu.memory_space<vmem>>, vector<8x128xf32>
      tpu.vector_store %arg10[%c0_37, %c0_38], %46 {strides = array<i32>} : memref<8x128xf32, #tpu.memory_space<vmem>>, vector<8x128xf32>,
    } else {
    }
    %c0 = arith.constant 0 : index
    %c0_1 = arith.constant 0 : index
    %3 = vector.load %arg7[%c0, %c0_1] : memref<8x128xbf16, #tpu.memory_space<vmem>>, vector<8x128xbf16>
    %c0_2 = arith.constant 0 : index
    %c0_3 = arith.constant 0 : index
    %4 = vector.load %arg3[%c0_2, %c0_3] : memref<128x128xbf16, #tpu.memory_space<vmem>>, vector<128x128xbf16>
    %cst = arith.constant dense<0.000000e+00> : vector<8x128xf32>
    %5 = tpu.matmul %3, %4, %cst {dimension_numbers = #tpu.dot_dimension_numbers<[1], [1], [0], [0], [0, 0, 1, 0], [], []>} : vector<8x128xbf16>, vector<128x128xbf16>, vector<8x128xf32> -> vector<8x128xf32>
    %c0_4 = arith.constant 0 : index
    %c0_5 = arith.constant 0 : index
    %6 = vector.load %arg5[%c0_4, %c0_5] : memref<1x128xf32, #tpu.memory_space<vmem>>, vector<1x128xf32>
    %7 = vector.broadcast %6 : vector<1x128xf32> to vector<8x128xf32>
    %8 = arith.addf %5, %7 : vector<8x128xf32>
    %c0_6 = arith.constant 0 : index
    %c0_7 = arith.constant 0 : index
    %9 = vector.load %arg8[%c0_6, %c0_7] : memref<8x1xf32, #tpu.memory_space<vmem>>, vector<8x1xf32>
    %cst_8 = arith.constant dense<0xFF800000> : vector<8xf32>
    %10 = vector.multi_reduction <maximumf>, %8, %cst_8 [1] : vector<8x128xf32> to vector<8xf32>
    %11 = vector.shape_cast %10 : vector<8xf32> to vector<8x1xf32>
    %12 = arith.maximumf %9, %11 : vector<8x1xf32>
    %13 = arith.subf %9, %12 : vector<8x1xf32>
    %14 = math.exp %13 : vector<8x1xf32>
    %15 = vector.broadcast %12 : vector<8x1xf32> to vector<8x128xf32>
    %16 = arith.subf %8, %15 : vector<8x128xf32>
    %17 = math.exp %16 : vector<8x128xf32>
    %c0_9 = arith.constant 0 : index
    %c0_10 = arith.constant 0 : index
    %18 = vector.load %arg9[%c0_9, %c0_10] : memref<8x1xf32, #tpu.memory_space<vmem>>, vector<8x1xf32>
    %19 = arith.mulf %14, %18 : vector<8x1xf32>
    %cst_11 = arith.constant dense<0.000000e+00> : vector<8xf32>
    %20 = vector.multi_reduction <add>, %17, %cst_11 [1] : vector<8x128xf32> to vector<8xf32>
    %21 = vector.shape_cast %20 : vector<8xf32> to vector<8x1xf32>
    %22 = arith.addf %19, %21 : vector<8x1xf32>
    %c0_12 = arith.constant 0 : index
    %c0_13 = arith.constant 0 : index
    %23 = vector.load %arg9[%c0_12, %c0_13] : memref<8x1xf32, #tpu.memory_space<vmem>>, vector<8x1xf32>
    tpu.vector_store %arg9[%c0_12, %c0_13], %22 {strides = array<i32>} : memref<8x1xf32, #tpu.memory_space<vmem>>, vector<8x1xf32>,
    %c0_14 = arith.constant 0 : index
    %c0_15 = arith.constant 0 : index
    %24 = vector.load %arg10[%c0_14, %c0_15] : memref<8x128xf32, #tpu.memory_space<vmem>>, vector<8x128xf32>
    %25 = vector.broadcast %14 : vector<8x1xf32> to vector<8x128xf32>
    %26 = arith.mulf %25, %24 : vector<8x128xf32>
    %27 = arith.truncf %17 : vector<8x128xf32> to vector<8x128xbf16>
    %c0_16 = arith.constant 0 : index
    %c0_17 = arith.constant 0 : index
    %28 = vector.load %arg4[%c0_16, %c0_17] : memref<128x128xbf16, #tpu.memory_space<vmem>>, vector<128x128xbf16>
    %cst_18 = arith.constant dense<0.000000e+00> : vector<8x128xf32>
    %29 = tpu.matmul %27, %28, %cst_18 {dimension_numbers = #tpu.dot_dimension_numbers<[1], [0], [0], [1], [0, 0, 1, 1], [], []>} : vector<8x128xbf16>, vector<128x128xbf16>, vector<8x128xf32> -> vector<8x128xf32>
    %30 = arith.addf %26, %29 : vector<8x128xf32>
    %c0_19 = arith.constant 0 : index
    %c0_20 = arith.constant 0 : index
    %31 = vector.load %arg10[%c0_19, %c0_20] : memref<8x128xf32, #tpu.memory_space<vmem>>, vector<8x128xf32>
    tpu.vector_store %arg10[%c0_19, %c0_20], %30 {strides = array<i32>} : memref<8x128xf32, #tpu.memory_space<vmem>>, vector<8x128xf32>,
    %c0_21 = arith.constant 0 : index
    %c0_22 = arith.constant 0 : index
    %32 = vector.load %arg8[%c0_21, %c0_22] : memref<8x1xf32, #tpu.memory_space<vmem>>, vector<8x1xf32>
    tpu.vector_store %arg8[%c0_21, %c0_22], %12 {strides = array<i32>} : memref<8x1xf32, #tpu.memory_space<vmem>>, vector<8x1xf32>,
    %c0_i32_23 = arith.constant 0 : i32
    %33 = arith.cmpi eq, %arg1, %c0_i32_23 : i32
    %34 = arith.extui %33 : i1 to i32
    %c0_i32_24 = arith.constant 0 : i32
    %35 = arith.cmpi ne, %34, %c0_i32_24 : i32
    scf.if %35 {
      %c0_25 = arith.constant 0 : index
      %c0_26 = arith.constant 0 : index
      %36 = vector.load %arg10[%c0_25, %c0_26] : memref<8x128xf32, #tpu.memory_space<vmem>>, vector<8x128xf32>
      %c0_27 = arith.constant 0 : index
      %c0_28 = arith.constant 0 : index
      %37 = vector.load %arg9[%c0_27, %c0_28] : memref<8x1xf32, #tpu.memory_space<vmem>>, vector<8x1xf32>
      %38 = vector.broadcast %37 : vector<8x1xf32> to vector<8x128xf32>
      %39 = arith.divf %36, %38 : vector<8x128xf32>
      %c0_29 = arith.constant 0 : index
      %c0_30 = arith.constant 0 : index
      %40 = vector.load %arg6[%c0_29, %c0_30] : memref<8x128xf32, #tpu.memory_space<vmem>>, vector<8x128xf32>
      tpu.vector_store %arg6[%c0_29, %c0_30], %39 {strides = array<i32>} : memref<8x128xf32, #tpu.memory_space<vmem>>, vector<8x128xf32>,
    } else {
    }
    return
  }
  func.func @transform_0(%arg0: i32, %arg1: i32) -> (i32, i32) {
    %c0_i32 = arith.constant 0 : i32
    %c0_i32_0 = arith.constant 0 : i32
    return %arg0, %c0_i32 : i32, i32
  }
  func.func @transform_1(%arg0: i32, %arg1: i32) -> (i32, i32) {
    %c0_i32 = arith.constant 0 : i32
    %c0_i32_0 = arith.constant 0 : i32
    return %arg1, %c0_i32 : i32, i32
  }
  func.func @transform_2(%arg0: i32, %arg1: i32) -> (i32, i32) {
    %c0_i32 = arith.constant 0 : i32
    %c0_i32_0 = arith.constant 0 : i32
    return %arg1, %c0_i32 : i32, i32
  }
  func.func @transform_3(%arg0: i32, %arg1: i32) -> (i32, i32) {
    %c0_i32 = arith.constant 0 : i32
    %c0_i32_0 = arith.constant 0 : i32
    return %c0_i32, %arg1 : i32, i32
  }
  func.func @transform_4(%arg0: i32, %arg1: i32) -> (i32, i32) {
    %c0_i32 = arith.constant 0 : i32
    %c0_i32_0 = arith.constant 0 : i32
    return %arg0, %c0_i32 : i32, i32
  }
}

</mosaic_0001>

<bundles_post_ra>
// kernel: tpu_custom_call.1
= control target key start
LH: loop header
LB: loop body
LE: loop exit
PB: predicated region body
PF: predicated region fallthrough
CT: control target
= control target key end

     0   :  { %9 = vsyncpa [#allocation7], 0  ;;  %s617_s0 = inlined_call_operand.hbm [shape: bf16[8,128], index: 0, kind: input, shape index: {}]   ;;  %s618_s1 = inlined_call_operand.hbm [shape: bf16[128,128], index: 1, kind: input, shape index: {}]   ;;  %s619_s2 = inlined_call_operand.hbm [shape: bf16[128,128], index: 2, kind: input, shape index: {}]   ;;  %s620_s3 = inlined_call_operand.vmem [shape: f32[1,128], index: 3, kind: input, shape index: {}]   ;;  %s621_s4 = inlined_call_operand.hbm [shape: f32[8,128], index: 4, kind: output, shape index: {}]  }
   0x1   :  { %10 = vsyncpa [#allocation10], 0 }
   0x2   :  { %11 = vsyncpa [#allocation8], 0  ;;  %s544_s15 = smov [#allocation9]  }
   0x3   :  { %s27_s16 = sshll.u32 %s544_s15, 4  ;;  %s28_s16 = int_to_ptr.vmem [resolvable:$true] %s27_s16 }
   0x4   :  { %s466_s17 = scalar_lea.vmem %s28_s16, 1024  ;;  %p471_p1 = scmp.lt.s32.totalorder %s28_s16, %s28_s16 }
   0x5   :  { %p467_p0 = scmp.ne.s32.totalorder %s28_s16, %s466_s17  ;;  %p472_p2 = scmp.lt.s32.totalorder %s466_s17, %s466_s17 }
   0x7   :  { %p473_p3 = por %p472_p2, %p471_p1 }
   0x9   :  { %p474_p4 = pnand %p473_p3, %p467_p0 }
   0xb   :  { %477 = shalt.err (!%p474_p4)
}
   0xc   :  { %s545_s18 = smov 64   ;;  %s546_s19 = smov 4  }
   0xd   :  { %33 = dma.hbm_to_vmem [thread:$0]  %s618_s1, 1024, %s28_s16, [#allocation10], %s545_s18, %s545_s18, %s546_s19  }
   0xe   :  { %s547_s22 = smov [#allocation6]   ;;  %s548_s24 = smov [#allocation11]  }
   0xf   :  { %s18_s23 = sshll.u32 %s547_s22, 4  ;;  %s39_s25 = sshll.u32 %s548_s24, 4  ;;  %s19_s23 = int_to_ptr.vmem [resolvable:$true] %s18_s23  ;;  %s40_s25 = int_to_ptr.vmem [resolvable:$true] %s39_s25 }
  0x10   :  { %s486_s26 = scalar_lea.vmem %s19_s23, 64  ;;  %p491_p6 = scmp.lt.s32.totalorder %s19_s23, %s19_s23 }
  0x11   :  { %p487_p5 = scmp.ne.s32.totalorder %s19_s23, %s486_s26  ;;  %p492_p7 = scmp.lt.s32.totalorder %s486_s26, %s486_s26 }
  0x13   :  { %p493_p8 = por %p492_p7, %p491_p6 }
  0x15   :  { %p494_p9 = pnand %p493_p8, %p487_p5 }
  0x17   :  { %497 = shalt.err (!%p494_p9)
}
  0x18   :  { %21 = dma.hbm_to_vmem [thread:$0]  %s617_s0, 64, %s19_s23, [#allocation7]  }
  0x19   :  { %s506_s29 = scalar_lea.vmem %s40_s25, 1024  ;;  %p511_p11 = scmp.lt.s32.totalorder %s40_s25, %s40_s25 }
  0x1a   :  { %p507_p10 = scmp.ne.s32.totalorder %s40_s25, %s506_s29  ;;  %p512_p12 = scmp.lt.s32.totalorder %s506_s29, %s506_s29 }
  0x1c   :  { %p513_p13 = por %p512_p12, %p511_p11 }
  0x1e   :  { %p514_p0 = pnand %p513_p13, %p507_p10 }
  0x20   :  { %517 = shalt.err (!%p514_p0)
}
  0x21   :  { %45 = dma.hbm_to_vmem [thread:$0]  %s619_s2, 1024, %s40_s25, [#allocation10], %s545_s18, %s545_s18, %s546_s19  }
  0x22   :  { %538 = dma.done.wait [#allocation7], 64  }
  0x23   :  { %539 = vsyncadd [#allocation7], 4294967232 }
  0x24   :  { %540 = dma.done.wait [#allocation10], 2048  }
  0x25   :  { %541 = vsyncadd [#allocation10], 4294965248  ;;  %v549_v0 = vmov 0.0   ;;  %vm550_vm0 = vmmov 0   ;;  %v436_v1 = vld [vmem:[#allocation9 + $0x38] sm:$0xff]   ;;  %v437_v2 = vld [vmem:[#allocation9 + $0x30] sm:$0xff]  }
  0x26   :  { %384 = vmatprep.subr.bf16.mxu0 %v549_v0  ;;  %400 = vmatprep.mubr.msk.bf16.mxu0 %vm550_vm0, %v549_v0  ;;  %v62_v3 = vld [vmem:[#allocation6] sm:$0xf]  ;;  %v438_v7 = vld [vmem:[#allocation9 + $0x28] sm:$0xff]   ;;  %v439_v8 = vld [vmem:[#allocation9 + $0x20] sm:$0xff]   ;;  %vm67_vm1 = vcmask 7168   ;;  %v551_v14 = vmov -inf  }
  0x27   :  { %404 = vmatprep.subr.bf16.mxu1 %v549_v0  ;;  %420 = vmatprep.mubr.msk.bf16.mxu1 %vm550_vm0, %v549_v0  ;;  %v63_v4 = vunpack.c.l.bf16 %v62_v3  ;;  %v440_v9 = vld [vmem:[#allocation9 + $0x18] sm:$0xff]   ;;  %v441_v10 = vld [vmem:[#allocation9 + $0x10] sm:$0xff]   ;;  %v442_v11 = vld [vmem:[#allocation9 + $0x8] sm:$0xff]   ;;  %68 = vst.msk [vmem:[#allocation3] sm:$0xff] %vm67_vm1, %v551_v14  ;;  %v552_v21 = vmov 0  }
  0x28   :  { %385 = vmatpush3.bf16.xpose.msra.mxu0 %v436_v1  ;;  %v443_v12 = vld [vmem:[#allocation9] sm:$0xff]   ;;  %69 = vst.msk [vmem:[#allocation4] sm:$0xff] %vm67_vm1, %v549_v0  ;;  %v349_v15 = vld [vmem:[%s620_s3] ss:$0 sm:$0xff]  ;;  %434 = vset.pattern.permute.xlu0 %v552_v21  ;;  %v444_v22 = vld [vmem:[#allocation11 + $0x38] sm:$0xff]   ;;  %s553_s3 = smov [#allocation12]  }
  0x29   :  { %386 = vmatprep.subr.bf16.mxu0 %v549_v0  ;;  %v64_v5 = vmul.f32 0.17677669, %v63_v4  ;;  %435 = vset.pattern.permute.xlu1 %v552_v21  ;;  %v445_v23 = vld [vmem:[#allocation11 + $0x30] sm:$0xff]   ;;  %v446_v24 = vld [vmem:[#allocation11 + $0x28] sm:$0xff]   ;;  %v447_v26 = vld [vmem:[#allocation11 + $0x20] sm:$0xff]   ;;  %s339_s5 = sshll.u32 %s553_s3, 4  ;;  %s340_s5 = int_to_ptr.vmem [resolvable:$true] %s339_s5 }
  0x2a   :  { %405 = vmatpush3.bf16.msra.mxu1 %v444_v22  ;;  %v448_v29 = vld [vmem:[#allocation11 + $0x18] sm:$0xff]   ;;  %v449_v31 = vld [vmem:[#allocation11 + $0x10] sm:$0xff]   ;;  %v450_v32 = vld [vmem:[#allocation11 + $0x8] sm:$0xff]   ;;  %s518_s6 = scalar_lea.vmem %s340_s5, 128  ;;  %p523_p2 = scmp.lt.s32.totalorder %s340_s5, %s340_s5 }
  0x2b   :  { %v65_v6 = vpack.c.bf16 %v64_v5, %v64_v5  ;;  %406 = vmatprep.subr.bf16.mxu1 %v549_v0  ;;  %v451_v33 = vld [vmem:[#allocation11] sm:$0xff]   ;;  %p519_p1 = scmp.ne.s32.totalorder %s340_s5, %s518_s6  ;;  %p524_p3 = scmp.lt.s32.totalorder %s518_s6, %s518_s6 }
  0x2d   :  { %66 = vst [vmem:[#allocation2] sm:$0xf] %v65_v6  ;;  %p525_p4 = por %p524_p3, %p523_p2 }
  0x2e   :  { %407 = vmatpush3.bf16.msra.mxu1 %v445_v23  ;;  %v183_v25 = vld [vmem:[#allocation3] sm:$0xff] }
  0x2f   :  { %408 = vmatprep.subr.bf16.mxu1 %v549_v0  ;;  %v198_v41 = vld [vmem:[#allocation4] sm:$0xff]  ;;  %p526_p5 = pnand %p525_p4, %p519_p1 }
  0x30   :  { %387 = vmatpush3.bf16.xpose.msra.mxu0 %v437_v2 }
  0x31   :  { %388 = vmatprep.subr.bf16.mxu0 %v549_v0 }
  0x32   :  { %409 = vmatpush3.bf16.msra.mxu1 %v446_v24 }
  0x33   :  { %410 = vmatprep.subr.bf16.mxu1 %v549_v0 }
  0x34   :  { %v71_v13 = vld [vmem:[#allocation2] sm:$0xf] }
  0x36   :  { %411 = vmatpush3.bf16.msra.mxu1 %v447_v26 }
  0x37   :  { %412 = vmatprep.subr.bf16.mxu1 %v549_v0 }
  0x38   :  { %389 = vmatpush3.bf16.xpose.msra.mxu0 %v438_v7 }
  0x39   :  { %390 = vmatprep.subr.bf16.mxu0 %v549_v0 }
  0x3a   :  { %413 = vmatpush3.bf16.msra.mxu1 %v448_v29 }
  0x3b   :  { %414 = vmatprep.subr.bf16.mxu1 %v549_v0 }
  0x3e   :  { %415 = vmatpush3.bf16.msra.mxu1 %v449_v31 }
  0x3f   :  { %416 = vmatprep.subr.bf16.mxu1 %v549_v0 }
  0x40   :  { %391 = vmatpush3.bf16.xpose.msra.mxu0 %v439_v8 }
  0x41   :  { %392 = vmatprep.subr.bf16.mxu0 %v549_v0 }
  0x42   :  { %417 = vmatpush3.bf16.msra.mxu1 %v450_v32 }
  0x43   :  { %418 = vmatprep.subr.bf16.mxu1 %v549_v0 }
  0x46   :  { %419 = vmatpush3.bf16.msra.mxu1 %v451_v33 }
  0x48   :  { %393 = vmatpush3.bf16.xpose.msra.mxu0 %v440_v9 }
  0x49   :  { %394 = vmatprep.subr.bf16.mxu0 %v549_v0 }
  0x50   :  { %395 = vmatpush3.bf16.xpose.msra.mxu0 %v441_v10 }
  0x51   :  { %396 = vmatprep.subr.bf16.mxu0 %v549_v0 }
  0x58   :  { %397 = vmatpush3.bf16.xpose.msra.mxu0 %v442_v11 }
  0x59   :  { %398 = vmatprep.subr.bf16.mxu0 %v549_v0 }
  0x60   :  { %399 = vmatpush3.bf16.xpose.msra.mxu0 %v443_v12 }
  0x67   :  { %401 = vmatmul.mubr.bf16.vlgmr.msra.gmra.mxu0 %v71_v13 }
 0x127   :  { %v177_v16 = vpop.f32.mrf.mxu0 }
 0x128   :  { %v178_v17 = vadd.f32 %v349_v15, %v177_v16 }
 0x129   :  { %v402_v18 = vpop.f32.mrf.mxu0 }
 0x12a   :  { %184 = vmax.xlane.f32.xlu0 %v178_v17 }
 0x12b   :  { %v180_v19 = vpop.f32.mrf.mxu0 }
 0x12d   :  { %v403_v20 = vpop.f32.mrf.mxu0 }
 0x1b3   :  { %v185_v27 = vpop.xlane.xlu0 %184 }
 0x1b4   :  { %v186_v28 = vmax.f32 %v183_v25, %v185_v27 }
 0x1b6   :  { %v187_v30 = vsub.f32 %v183_v25, %v186_v28  ;;  %319 = vst.msk [vmem:[#allocation3] sm:$0xff] %vm67_vm1, %v186_v28  ;;  %192 = vperm.xlu0 %434, %v186_v28  }
 0x1b8   :  { %v188_v39 = vmul.f32 1.442695, %v187_v30 }
 0x231   :  { %v193_v34 = vpop.permute.xlu0 %192 }
 0x232   :  { %v195_v35 = vsub.f32 %v178_v17, %v193_v34 }
 0x234   :  { %v196_v36 = vmul.f32 1.442695, %v195_v35 }
 0x236   :  { %452 = vpow2.f32 %v196_v36 }
 0x237   :  { %454 = vpow2.f32 %v188_v39 }
 0x243   :  { %v453_v37 = vpop.eup %452 }
 0x244   :  { %200 = vadd.xlane.f32.xlu1 %v453_v37  ;;  %v212_v38 = vpack.c.bf16 %v453_v37, %v453_v37  ;;  %v455_v40 = vpop.eup %454 }
 0x245   :  { %v199_v42 = vmul.f32 %v455_v40, %v198_v41 }
 0x246   :  { %421 = vmatmul.mubr.bf16.vlgmr.msra.gmra.mxu1 %v212_v38 }
 0x2cd   :  { %v201_v43 = vpop.xlane.xlu1 %200 }
 0x2ce   :  { %v202_v44 = vadd.f32 %v201_v43, %v199_v42 }
 0x2d0   :  { %204 = vst.msk [vmem:[#allocation4] sm:$0xff] %vm67_vm1, %v202_v44 }
 0x2d7   :  { %v324_v45 = vld [vmem:[#allocation4] sm:$0xff] }
 0x2d8   :  { %327 = vperm.xlu1 %435, %v324_v45  }
 0x2dc   :  { %208 = vperm.xlu1 %435, %v455_v40  }
 0x306   :  { %v311_v46 = vpop.f32.mrf.mxu1 }
 0x308   :  { %v422_v47 = vpop.f32.mrf.mxu1 }
 0x30a   :  { %v314_v48 = vpop.f32.mrf.mxu1 }
 0x30c   :  { %v423_v49 = vpop.f32.mrf.mxu1 }
 0x353   :  { %v328_v50 = vpop.permute.xlu1 %327 }
 0x354   :  { %456 = vrcp.f32 %v328_v50 }
 0x357   :  { %v209_v51 = vpop.permute.xlu1 %208 }
 0x358   :  { %v211_v52 = vmul.f32 0.0, %v209_v51 }
 0x35a   :  { %v317_v53 = vadd.f32 %v311_v46, %v211_v52 }
 0x361   :  { %v457_v54 = vpop.eup %456 }
 0x362   :  { %v331_v55 = vmul.f32 %v457_v54, %v317_v53 }
 0x364   :  { %332 = vst [vmem:[#allocation12] sm:$0xff] %v331_v55 }
 0x365   :  { %529 = shalt.err (!%p526_p5)
}
 0x366   :  { %342 = dma.vmem_to_hbm [thread:$0]  %s340_s5, 128, %s621_s4, [#allocation8]  }
 0x367   :  { %542 = dma.done.wait [#allocation8], 128  }
 0x368   :  { %543 = vsyncadd [#allocation8], 4294967168 }
 0x369   :  { %346 = vsyncpa [#allocation7], 1 }
 0x36a   :  { %347 = vsyncpa [#allocation10], 1 }
 0x36b   :  { %348 = vsyncpa [#allocation8], 1 }

</bundles_post_ra>
